<compile_context>
chip_gen: v7x
topology: tpu7x:2x2x1
jax: 0.10.0
libtpu: 0.0.40
codegen_flags: <defaults>
</compile_context>

<pallas_src>
import jax
import jax.numpy as jnp
from jax.experimental import pallas as pl
from jax.experimental.pallas import tpu as pltpu


def _round_up(n, m):
    return ((n + m - 1) // m) * m


_TARGET_TILE_BYTES = 4 << 20   # ~4 MiB x tile: amortizes ~0.35us per-grid-step overhead
_VMEM_BUDGET_BYTES = 40 << 20  # double-buffered working set budget (fits v7x 64 MiB)


def _choose_batch_tile(B, D, H, block_b=None):
    """Pick the batch tile by bytes, not rows; keep the working set in budget."""
    if block_b is None:
        tb = max(256, ((_TARGET_TILE_BYTES // (4 * max(D, 1))) // 128) * 128)
        # Per-grid-step VMEM estimate (f32):
        #   x double-buffered: 2*tb*D, resident w1t/b1/w2 (double-buffered): 2*(D*H+2H),
        #   hidden (tb, H) intermediate: tb*H, output double-buffered: 2*tb.
        resident = 8 * (D * H + 2 * H)
        per_row = 4 * (2 * D + H + 2)
        if _VMEM_BUDGET_BYTES > resident + 256 * per_row:
            tb = min(tb, ((_VMEM_BUDGET_BYTES - resident) // per_row // 128) * 128)
        else:
            tb = 256
    else:
        tb = block_b
    if tb >= B:
        return B                                  # single block == full array (any B)
    return _round_up(max(tb, 128), 128)           # multi-tile: sublane/lane aligned


def _discriminator_kernel(x_ref, w1t_ref, b1_ref, w2_ref, b2_ref, o_ref):
    # x: (tb, D)  w1t: (D, H)  b1: (1, H)  w2: (1, H)  b2: SMEM (1,)  o: (tb, 1)
    # Layer 1: canonical MXU matmul (no operand transpose), f32 accumulation.
    h = jnp.dot(x_ref[...], w1t_ref[...], preferred_element_type=jnp.float32)
    h = jnp.maximum(h + b1_ref[...], 0.0)
    # Layer 2 (output width 1): VPU multiply + XLU lane-reduce instead of an N=1 matmul.
    logit = jnp.sum(h * w2_ref[...], axis=-1, keepdims=True) + b2_ref[0]  # (tb, 1)
    # Sigmoid: exp goes to the EUP; this kernel is HBM-bound so it is free filler.
    o_ref[...] = (1.0 / (1.0 + jnp.exp(-logit))).astype(o_ref.dtype)


def discriminator_forward(x, w1, b1, w2, b2, *, block_b=None):
    """sigmoid(relu(x @ w1.T + b1) @ w2.T + b2), PyTorch nn.Linear weight layout.

    x : (B, D) float32
    w1: (H, D)  b1: (H,)    -- Linear(input_dim, hidden_dim)
    w2: (1, H)  b2: (1,)    -- Linear(hidden_dim, 1)
    returns (B, 1) float32
    """
    B, D = x.shape
    H = w1.shape[0]

    tb = _choose_batch_tile(B, D, H, block_b)
    n_tiles = pl.cdiv(B, tb)                    # ragged last block handled by Pallas

    # One-time layout plumbing outside the hot loop (review: avoid in-kernel transpose).
    w1t = jnp.transpose(w1)                     # (D, H)
    b1_row = b1.reshape(1, H)
    w2_row = w2.reshape(1, H)

    vmem_workset = 4 * (2 * tb * D + 2 * (D * H + 2 * H) + tb * H + 2 * tb)
    vmem_limit = int(min(max(2 * vmem_workset, 32 << 20), 64 << 20))

    cost = pl.CostEstimate(
        flops=2 * B * D * H + 2 * B * H,
        transcendentals=B,
        bytes_accessed=4 * (B * D + D * H + 3 * H + 1 + B),
    )

    out = pl.pallas_call(
        _discriminator_kernel,
        out_shape=jax.ShapeDtypeStruct((B, 1), jnp.float32),
        grid=(n_tiles,),
        in_specs=[
            pl.BlockSpec((tb, D), lambda i: (i, 0)),            # x tile, pipelined
            pl.BlockSpec((D, H), lambda i: (0, 0)),             # w1^T resident
            pl.BlockSpec((1, H), lambda i: (0, 0)),             # b1 row resident
            pl.BlockSpec((1, H), lambda i: (0, 0)),             # w2 row resident
            pl.BlockSpec(memory_space=pltpu.MemorySpace.SMEM),  # b2 scalar
        ],
        out_specs=pl.BlockSpec((tb, 1), lambda i: (i, 0)),
        compiler_params=pltpu.CompilerParams(
            dimension_semantics=("parallel",),   # shard batch tiles across TCs (v7x)
            vmem_limit_bytes=vmem_limit,
        ),
        cost_estimate=cost,
    )(x, w1t, b1_row, w2_row, b2)

    return out


def init_discriminator_params(key, input_dim, hidden_dim):
    """Mimic torch.nn.Linear default init: U(-1/sqrt(fan_in), 1/sqrt(fan_in))."""
    k1, k2, k3, k4 = jax.random.split(key, 4)
    bound1 = 1.0 / jnp.sqrt(jnp.float32(input_dim))
    bound2 = 1.0 / jnp.sqrt(jnp.float32(hidden_dim))
    w1 = jax.random.uniform(k1, (hidden_dim, input_dim), jnp.float32, -bound1, bound1)
    b1 = jax.random.uniform(k2, (hidden_dim,), jnp.float32, -bound1, bound1)
    w2 = jax.random.uniform(k3, (1, hidden_dim), jnp.float32, -bound2, bound2)
    b2 = jax.random.uniform(k4, (1,), jnp.float32, -bound2, bound2)
    return w1, b1, w2, b2


def _reference(x, w1, b1, w2, b2):
    h = jnp.maximum(x @ w1.T + b1[None, :], 0.0)
    return 1.0 / (1.0 + jnp.exp(-(h @ w2.T + b2[None, :])))


if __name__ == "__main__":
    key = jax.random.PRNGKey(0)
    k_x, k_p, k_x2 = jax.random.split(key, 3)

    batch, input_dim, hidden_dim = 8, 16, 32
    x = jax.random.normal(k_x, (batch, input_dim), jnp.float32)
    params = init_discriminator_params(k_p, input_dim, hidden_dim)

    out = jax.block_until_ready(discriminator_forward(x, *params))
    ref = _reference(x, *params)
    assert out.shape == (batch, 1)
    assert jnp.allclose(out, ref, atol=1e-5, rtol=1e-5)

    # Multi-tile path with a ragged last block (B not a multiple of the tile);
    # no padding pass, last block is masked by Pallas and trimmed on write.
    batch2 = 300
    x2 = jax.random.normal(k_x2, (batch2, input_dim), jnp.float32)
    out2 = jax.block_until_ready(discriminator_forward(x2, *params, block_b=128))
    ref2 = _reference(x2, *params)
    assert out2.shape == (batch2, 1)
    assert jnp.allclose(out2, ref2, atol=1e-5, rtol=1e-5)

    print("KERNEL_OK")
</pallas_src>

<mosaic_0001>
module attributes {stable_mosaic.version = 11 : i64} {
  func.func @_discriminator_kernel(%arg0: i32, %arg1: memref<8x16xf32, #tpu.memory_space<vmem>>, %arg2: memref<16x32xf32, #tpu.memory_space<vmem>>, %arg3: memref<1x32xf32, #tpu.memory_space<vmem>>, %arg4: memref<1x32xf32, #tpu.memory_space<vmem>>, %arg5: memref<1xf32, #tpu.memory_space<smem>>, %arg6: memref<8x1xf32, #tpu.memory_space<vmem>>) attributes {dimension_semantics = [#tpu.dimension_semantics<parallel>], iteration_bounds = array<i64: 1>, scalar_prefetch = 0 : i64, scratch_operands = 0 : i64, tpu.core_type = #tpu.core_type<tc>, window_params = [{transform_indices = @transform_0, window_bounds = array<i64: 8, 16>}, {pipeline_mode = #tpu.pipeline_mode<synchronous>, transform_indices = @transform_1, window_bounds = array<i64: 16, 32>}, {pipeline_mode = #tpu.pipeline_mode<synchronous>, transform_indices = @transform_2, window_bounds = array<i64: 1, 32>}, {pipeline_mode = #tpu.pipeline_mode<synchronous>, transform_indices = @transform_3, window_bounds = array<i64: 1, 32>}, {transform_indices = @transform_4, window_bounds = array<i64: 1>}, {transform_indices = @transform_5, window_bounds = array<i64: 8, 1>}]} {
    %c0 = arith.constant 0 : index
    %c0_0 = arith.constant 0 : index
    %0 = vector.load %arg1[%c0, %c0_0] : memref<8x16xf32, #tpu.memory_space<vmem>>, vector<8x16xf32>
    %c0_1 = arith.constant 0 : index
    %c0_2 = arith.constant 0 : index
    %1 = vector.load %arg2[%c0_1, %c0_2] : memref<16x32xf32, #tpu.memory_space<vmem>>, vector<16x32xf32>
    %cst = arith.constant dense<0.000000e+00> : vector<8x32xf32>
    %2 = tpu.matmul %0, %1, %cst {dimension_numbers = #tpu.dot_dimension_numbers<[1], [0], [0], [1], [0, 0, 1, 1], [], []>} : vector<8x16xf32>, vector<16x32xf32>, vector<8x32xf32> -> vector<8x32xf32>
    %c0_3 = arith.constant 0 : index
    %c0_4 = arith.constant 0 : index
    %3 = vector.load %arg3[%c0_3, %c0_4] : memref<1x32xf32, #tpu.memory_space<vmem>>, vector<1x32xf32>
    %4 = vector.broadcast %3 : vector<1x32xf32> to vector<8x32xf32>
    %5 = arith.addf %2, %4 : vector<8x32xf32>
    %cst_5 = arith.constant 0.000000e+00 : f32
    %6 = vector.broadcast %cst_5 : f32 to vector<8x32xf32>
    %7 = arith.maximumf %5, %6 : vector<8x32xf32>
    %c0_6 = arith.constant 0 : index
    %c0_7 = arith.constant 0 : index
    %8 = vector.load %arg4[%c0_6, %c0_7] : memref<1x32xf32, #tpu.memory_space<vmem>>, vector<1x32xf32>
    %9 = vector.broadcast %8 : vector<1x32xf32> to vector<8x32xf32>
    %10 = arith.mulf %7, %9 : vector<8x32xf32>
    %cst_8 = arith.constant dense<0.000000e+00> : vector<8xf32>
    %11 = vector.multi_reduction <add>, %10, %cst_8 [1] : vector<8x32xf32> to vector<8xf32>
    %12 = vector.shape_cast %11 : vector<8xf32> to vector<8x1xf32>
    %c0_9 = arith.constant 0 : index
    %13 = memref.load %arg5[%c0_9] : memref<1xf32, #tpu.memory_space<smem>>
    %14 = vector.broadcast %13 : f32 to vector<8x1xf32>
    %15 = arith.addf %12, %14 : vector<8x1xf32>
    %cst_10 = arith.constant 0.000000e+00 : f32
    %16 = vector.broadcast %cst_10 : f32 to vector<8x1xf32>
    %17 = arith.subf %16, %15 : vector<8x1xf32>
    %18 = math.exp %17 : vector<8x1xf32>
    %cst_11 = arith.constant 1.000000e+00 : f32
    %19 = vector.broadcast %cst_11 : f32 to vector<8x1xf32>
    %20 = arith.addf %19, %18 : vector<8x1xf32>
    %cst_12 = arith.constant 1.000000e+00 : f32
    %21 = vector.broadcast %cst_12 : f32 to vector<8x1xf32>
    %22 = arith.divf %21, %20 : vector<8x1xf32>
    %c0_13 = arith.constant 0 : index
    %c0_14 = arith.constant 0 : index
    %23 = vector.load %arg6[%c0_13, %c0_14] : memref<8x1xf32, #tpu.memory_space<vmem>>, vector<8x1xf32>
    tpu.vector_store %arg6[%c0_13, %c0_14], %22 {strides = array<i32>} : memref<8x1xf32, #tpu.memory_space<vmem>>, vector<8x1xf32>,
    return
  }
  func.func @transform_0(%arg0: i32) -> (i32, i32) {
    %c0_i32 = arith.constant 0 : i32
    %c0_i32_0 = arith.constant 0 : i32
    return %arg0, %c0_i32 : i32, i32
  }
  func.func @transform_1(%arg0: i32) -> (i32, i32) {
    %c0_i32 = arith.constant 0 : i32
    %c0_i32_0 = arith.constant 0 : i32
    %c0_i32_1 = arith.constant 0 : i32
    return %c0_i32, %c0_i32_0 : i32, i32
  }
  func.func @transform_2(%arg0: i32) -> (i32, i32) {
    %c0_i32 = arith.constant 0 : i32
    %c0_i32_0 = arith.constant 0 : i32
    %c0_i32_1 = arith.constant 0 : i32
    return %c0_i32, %c0_i32_0 : i32, i32
  }
  func.func @transform_3(%arg0: i32) -> (i32, i32) {
    %c0_i32 = arith.constant 0 : i32
    %c0_i32_0 = arith.constant 0 : i32
    %c0_i32_1 = arith.constant 0 : i32
    return %c0_i32, %c0_i32_0 : i32, i32
  }
  func.func @transform_4(%arg0: i32) -> i32 {
    %c0_i32 = arith.constant 0 : i32
    %c0_i32_0 = arith.constant 0 : i32
    return %c0_i32 : i32
  }
  func.func @transform_5(%arg0: i32) -> (i32, i32) {
    %c0_i32 = arith.constant 0 : i32
    %c0_i32_0 = arith.constant 0 : i32
    return %arg0, %c0_i32 : i32, i32
  }
}

</mosaic_0001>

<bundles_post_ra>
// kernel: tpu_custom_call.1
= control target key start
LH: loop header
LB: loop body
LE: loop exit
PB: predicated region body
PF: predicated region fallthrough
CT: control target
= control target key end

     0   :  { %11 = vsyncpa [#allocation4], 0  ;;  %s316_s0 = inlined_call_operand.hbm [shape: f32[8,16], index: 0, kind: input, shape index: {}]   ;;  %s317_s1 = inlined_call_operand.hbm [shape: f32[16,32], index: 1, kind: input, shape index: {}]   ;;  %s318_s2 = inlined_call_operand.vmem [shape: f32[1,32], index: 2, kind: input, shape index: {}]   ;;  %s319_s3 = inlined_call_operand.vmem [shape: f32[1,32], index: 3, kind: input, shape index: {}]   ;;  %s320_s4 = inlined_call_operand.<no memory space> [shape: f32[1], index: 4, kind: input, shape index: {}]   ;;  %s321_s5 = inlined_call_operand.vmem [shape: f32[8,1], index: 5, kind: output, shape index: {}]  }
   0x1   :  { %12 = vsyncpa [#allocation6], 0  ;;  %s236_s18 = smov [#allocation3]   ;;  %s237_s20 = smov [#allocation5]  }
   0x2   :  { %s19_s19 = sshll.u32 %s236_s18, 4  ;;  %s28_s21 = sshll.u32 %s237_s20, 4  ;;  %s20_s19 = int_to_ptr.vmem [resolvable:$true] %s19_s19  ;;  %s273_s21 = int_to_ptr.vmem [resolvable:$true] %s28_s21 }
   0x3   :  { %s188_s24 = scalar_lea.hbm %s316_s0, 128 }
   0x4   :  { %p189_p0 = scmp.ne.s32.totalorder %s316_s0, %s188_s24  ;;  %p192_p1 = scmp.lt.u32.totalorder %s188_s24, %s316_s0 }
   0x6   :  { %p194_p2 = pnand %p192_p1, %p189_p0 }
   0x8   :  { %197 = shalt.err (!%p194_p2)
}
   0x9   :  { %s198_s29 = scalar_lea.vmem %s20_s19, 128  ;;  %p203_p4 = scmp.lt.s32.totalorder %s20_s19, %s20_s19 }
   0xa   :  { %p199_p3 = scmp.ne.s32.totalorder %s20_s19, %s198_s29  ;;  %p204_p5 = scmp.lt.s32.totalorder %s198_s29, %s198_s29 }
   0xc   :  { %p205_p6 = por %p204_p5, %p203_p4 }
   0xe   :  { %p206_p7 = pnand %p205_p6, %p199_p3 }
  0x10   :  { %209 = shalt.err (!%p206_p7)
}
  0x11   :  { %22 = dma.hbm_to_vmem [thread:$0]  %s316_s0, 128, %s20_s19, [#allocation4]  }
  0x12   :  { %s210_s9 = scalar_lea.hbm %s317_s1, 256 }
  0x13   :  { %p211_p8 = scmp.ne.s32.totalorder %s317_s1, %s210_s9  ;;  %p214_p9 = scmp.lt.u32.totalorder %s210_s9, %s317_s1 }
  0x15   :  { %p216_p10 = pnand %p214_p9, %p211_p8 }
  0x17   :  { %219 = shalt.err (!%p216_p10)
}
  0x18   :  { %s220_s14 = scalar_lea.vmem %s273_s21, 256  ;;  %p225_p12 = scmp.lt.s32.totalorder %s273_s21, %s273_s21 }
  0x19   :  { %p221_p11 = scmp.ne.s32.totalorder %s273_s21, %s220_s14  ;;  %p226_p13 = scmp.lt.s32.totalorder %s220_s14, %s220_s14 }
  0x1b   :  { %p227_p0 = por %p226_p13, %p225_p12 }
  0x1d   :  { %p228_p1 = pnand %p227_p0, %p221_p11 }
  0x1f   :  { %231 = shalt.err (!%p228_p1)
}
  0x20   :  { %s238_s0 = smov 128   ;;  %s239_s15 = smov 8  }
  0x21   :  { %34 = dma.hbm_to_vmem [thread:$0]  %s317_s1, 256, %s273_s21, [#allocation6], %s238_s0, %s238_s0, %s239_s15  }
  0x22   :  { %232 = dma.done.wait [#allocation4], 128  }
  0x23   :  { %233 = vsyncadd [#allocation4], 4294967168 }
  0x24   :  { %234 = dma.done.wait [#allocation6], 256  }
  0x25   :  { %235 = vsyncadd [#allocation6], 4294967040  ;;  %v240_v0 = vmov 0.0|0.0   ;;  %vm241_vm0 = vmmov 0   ;;  %v242_v1 = vmov 0.0   ;;  %v48_v2 = vld [vmem:[#allocation5] sm:$0xff]  ;;  %v145_v14 = vstv %s320_s4 }
  0x26   :  { %174 = vmatprep.subr.bf16.mxu0 %v240_v0  ;;  %171 = vmatprep.mubr.msk.f32.mxu0 %vm241_vm0, %v242_v1  ;;  %v49_v3 = vld [vmem:[#allocation5 + $0x8] sm:$0xff]  ;;  %v47_v5 = vld [vmem:[#allocation3] sm:$0xff]  ;;  %vm57_vm1 = vcmask 130048   ;;  %vm140_vm2 = vcmask 261120   ;;  %vm153_vm3 = vcmask 7168  }
  0x27   :  { %v175_v4 = vpack.c.bf16 %v49_v3, %v48_v2  ;;  %v161_v6 = vld [vmem:[%s318_s2] ss:$0 sm:$0xff] }
  0x28   :  { %v163_v10 = vld [vmem:[%s319_s3] ss:$0 sm:$0xff] }
  0x29   :  { %176 = vmatpush3.bf16.msra.mxu0 %v175_v4 }
  0x2c   :  { %172 = vmatmul.mubr.msk.f32.vlgmr.msra.gmra.mrb[0].mxu0 %vm57_vm1, %v47_v5 }
  0xff   :  { %v127_v7 = vpop.f32.mrb[0].mxu0 }
 0x100   :  { %v128_v8 = vadd.f32 %v161_v6, %v127_v7  ;;  %v173_v9 = vpop.f32.mrb[1].mxu0 }
 0x102   :  { %v131_v11 = vmax.f32 %v128_v8, 0.0 }
 0x104   :  { %v139_v12 = vmul.f32 %v163_v10, %v131_v11 }
 0x106   :  { %v141_v13 = vsel %vm140_vm2, %v139_v12, 0.0 }
 0x107   :  { %142 = vadd.xlane.f32.xlu0 %v141_v13 }
 0x194   :  { %v143_v15 = vpop.xlane.xlu0 %142 }
 0x195   :  { %v146_v16 = vadd.f32 %v145_v14, %v143_v15 }
 0x197   :  { %v147_v17 = vsub.f32 0.0, %v146_v16 }
 0x199   :  { %v148_v18 = vmul.f32 1.442695, %v147_v17 }
 0x19b   :  { %184 = vpow2.f32 %v148_v18 }
 0x1a5   :  { %v185_v19 = vpop.eup %184 }
 0x1a6   :  { %v150_v20 = vadd.f32 1.0, %v185_v19 }
 0x1a8   :  { %186 = vrcp.f32 %v150_v20 }
 0x1b2   :  { %v187_v21 = vpop.eup %186 }
 0x1b3   :  { %154 = vst.msk [vmem:[%s321_s5] sm:$0xff] %vm153_vm3, %v187_v21 }
 0x1b4   :  { %159 = vsyncpa [#allocation4], 1 }
 0x1b5   :  { %160 = vsyncpa [#allocation6], 1 }

</bundles_post_ra>
